<compile_context>
chip_gen: v7x
topology: tpu7x:2x2x1
jax: 0.10.0
libtpu: 0.0.40
codegen_flags: <defaults>
</compile_context>

<pallas_src>
import jax
import jax.numpy as jnp
from jax.experimental import pallas as pl
from jax.experimental.pallas import tpu as pltpu

BN_EPS = 1e-5
LANE = 128          # fc1/fc2 width and padded fc3 output width (lane-dense)
VEC_ROWS = 8        # packed small-vector slab rows (sublane-aligned)
ROW_ALIGN = 16      # bf16 sublane-tile height -> weight-slab row alignment


def _round_up(x, m):
    return ((x + m - 1) // m) * m


def actor_kernel(x_ref, w_ref, vec_ref, out_ref):
    s_pad = x_ref.shape[1]

    # Static slices of the coalesced bf16 weight slab (free views; one DMA
    # brought the whole slab in).
    w1 = w_ref[0:s_pad, :]
    w2 = w_ref[s_pad:s_pad + LANE, :]
    w3 = w_ref[s_pad + LANE:s_pad + 2 * LANE, :]

    # Per-feature vectors: each row is read once and broadcast exactly once
    # at its single use below (no repeated sublane-broadcast work).
    b1 = vec_ref[0:1, :]
    gamma = vec_ref[1:2, :]
    beta = vec_ref[2:3, :]
    b2 = vec_ref[3:4, :]
    b3 = vec_ref[4:5, :]          # zero-padded beyond action_size

    # fc1 + ReLU  (bf16 operands, f32 accumulation on the MXU)
    h1 = jnp.dot(x_ref[...], w1, preferred_element_type=jnp.float32) + b1
    h1 = jnp.maximum(h1, 0.0)

    # BatchNorm1d, training mode: batch mean / biased batch variance.
    # Centered variance (safer than E[x^2]-mean^2); constant multiply, no div.
    inv_n = 1.0 / h1.shape[0]                       # static Python constant
    mean = jnp.sum(h1, axis=0, keepdims=True) * inv_n
    c = h1 - mean
    var = jnp.sum(c * c, axis=0, keepdims=True) * inv_n
    h1n = c * (jax.lax.rsqrt(var + BN_EPS) * gamma) + beta

    # fc2 + ReLU
    h2 = jnp.dot(h1n.astype(jnp.bfloat16), w2,
                 preferred_element_type=jnp.float32) + b2
    h2 = jnp.maximum(h2, 0.0)

    # fc3 (padded to 128 cols) + tanh; lane-dense [B, 128] store.
    h3 = jnp.dot(h2.astype(jnp.bfloat16), w3,
                 preferred_element_type=jnp.float32) + b3
    out_ref[...] = jnp.tanh(h3)


def actor_forward(state, params):
    """state: [B, state_size] (or [state_size]).  Returns [B, action_size] f32."""
    if state.ndim == 1:                      # mirror torch.unsqueeze(state, 0)
        state = state[None, :]
    B, state_size = state.shape
    action_size = params["action_size"]
    s_pad = params["s_pad"]

    # bf16 input; zero-pad feature columns to the aligned slab width.
    x = state.astype(jnp.bfloat16)
    if state_size != s_pad:
        x = jnp.pad(x, ((0, 0), (0, s_pad - state_size)))

    wslab = params["wslab"]
    vecs = params["vecs"]
    args = (x, wslab, vecs)

    # Advisory cost estimate (rsqrt is per-feature, tanh per-element).
    flops = 2 * B * (s_pad * LANE + LANE * LANE + LANE * LANE)
    transcendentals = LANE + B * LANE
    bytes_accessed = (x.size * 2 + wslab.size * 2 + vecs.size * 4
                      + B * LANE * 4)

    # VMEM budget derived from actual resident bytes (inputs + output +
    # ~8 f32 [B,128] intermediates), with 2x headroom.  v7x-safe (64 MiB).
    resident = (x.size * 2 + wslab.size * 2 + vecs.size * 4
                + B * LANE * 4 + 8 * B * LANE * 4)
    vmem_limit = int(max(2 * resident, 1 << 20))

    vmem = pl.BlockSpec(memory_space=pltpu.MemorySpace.VMEM)
    out = pl.pallas_call(
        actor_kernel,
        out_shape=jax.ShapeDtypeStruct((B, LANE), jnp.float32),
        in_specs=[vmem] * len(args),
        out_specs=vmem,
        compiler_params=pltpu.CompilerParams(vmem_limit_bytes=vmem_limit),
        cost_estimate=pl.CostEstimate(
            flops=flops,
            transcendentals=transcendentals,
            bytes_accessed=bytes_accessed),
    )(*args)
    return out[:, :action_size]


def init_actor_params(key, state_size, action_size, fc1_units=128, fc2_units=128):
    """Deterministic init mirroring the PyTorch module's reset_parameters().

    hidden_init uses weight.size()[0] == out_features, so lim = 1/sqrt(out_features)
    for fc1/fc2 weights; biases keep nn.Linear's default U(-1/sqrt(in_features), .).
    All three weights (transposed to [in, out], fc3 zero-padded to LANE cols,
    fc1 rows zero-padded to a 16-aligned s_pad) are coalesced into one bf16
    slab [s_pad + 2*LANE, LANE].  b1/gamma/beta/b2/b3 pack into one [8,128]
    f32 slab.
    """
    assert fc1_units == LANE and fc2_units == LANE and action_size <= LANE

    ks = jax.random.split(key, 6)

    def u(k, shape, lim):
        return jax.random.uniform(k, shape, jnp.float32, -lim, lim)

    lim1 = 1.0 / jnp.sqrt(jnp.float32(fc1_units))     # hidden_init(fc1)
    lim2 = 1.0 / jnp.sqrt(jnp.float32(fc2_units))     # hidden_init(fc2)
    blim1 = 1.0 / jnp.sqrt(jnp.float32(state_size))   # default bias inits
    blim2 = 1.0 / jnp.sqrt(jnp.float32(fc1_units))
    blim3 = 1.0 / jnp.sqrt(jnp.float32(fc2_units))

    w1 = u(ks[0], (state_size, fc1_units), lim1)
    b1 = u(ks[1], (fc1_units,), blim1)
    w2 = u(ks[2], (fc1_units, fc2_units), lim2)
    b2 = u(ks[3], (fc2_units,), blim2)
    w3 = u(ks[4], (fc2_units, action_size), 0.003)
    b3 = u(ks[5], (action_size,), blim3)

    # Pad fc1 input rows to a bf16-tile-aligned count; pad fc3 to LANE cols.
    s_pad = _round_up(state_size, ROW_ALIGN)
    w1_pad = jnp.zeros((s_pad, fc1_units), jnp.float32).at[:state_size, :].set(w1)
    w3_pad = jnp.zeros((fc2_units, LANE), jnp.float32).at[:, :action_size].set(w3)
    b3_pad = jnp.zeros((LANE,), jnp.float32).at[:action_size].set(b3)

    # One contiguous bf16 weight slab: [w1_pad; w2; w3_pad].
    wslab = jnp.concatenate([w1_pad, w2, w3_pad], axis=0).astype(jnp.bfloat16)

    # Pack the five small per-feature vectors into one [8, 128] f32 slab.
    vecs = jnp.zeros((VEC_ROWS, LANE), jnp.float32)
    vecs = vecs.at[0, :].set(b1)                        # b1
    vecs = vecs.at[1, :].set(jnp.ones((fc1_units,)))    # gamma (BN weight)
    vecs = vecs.at[2, :].set(jnp.zeros((fc1_units,)))   # beta  (BN bias)
    vecs = vecs.at[3, :].set(b2)                        # b2
    vecs = vecs.at[4, :].set(b3_pad)                    # b3 (padded)

    return {
        "wslab": wslab,
        "vecs": vecs,
        "action_size": action_size,
        "state_size": state_size,
        "s_pad": s_pad,
    }


def _actor_reference(state, params, action_size):
    """Pure-JAX reference (same bf16 weights/input, f32 math) sanity check."""
    s_pad = params["s_pad"]
    w = params["wslab"].astype(jnp.float32)
    w1 = w[0:s_pad]
    w2 = w[s_pad:s_pad + LANE]
    w3 = w[s_pad + LANE:s_pad + 2 * LANE]
    b1 = params["vecs"][0]
    gamma = params["vecs"][1]
    beta = params["vecs"][2]
    b2 = params["vecs"][3]
    b3 = params["vecs"][4]

    x = state.astype(jnp.bfloat16).astype(jnp.float32)
    x = jnp.pad(x, ((0, 0), (0, s_pad - state.shape[1])))
    h1 = jnp.maximum(x @ w1 + b1, 0.0)
    mean = jnp.mean(h1, axis=0, keepdims=True)
    var = jnp.mean((h1 - mean) ** 2, axis=0, keepdims=True)
    h1n = (h1 - mean) * jax.lax.rsqrt(var + BN_EPS) * gamma + beta
    h2 = jnp.maximum(h1n @ w2 + b2, 0.0)
    return jnp.tanh(h2 @ w3 + b3)[:, :action_size]


if __name__ == "__main__":
    key = jax.random.PRNGKey(0)
    k_param, k_state = jax.random.split(key)

    batch = 8
    state_size = 32
    action_size = 4

    params = init_actor_params(k_param, state_size, action_size,
                               fc1_units=128, fc2_units=128)
    state = jax.random.normal(k_state, (batch, state_size), jnp.float32)

    out = actor_forward(state, params)
    out = jax.block_until_ready(out)

    assert out.shape == (batch, action_size)
    assert bool(jnp.all(jnp.isfinite(out)))
    assert bool(jnp.all(jnp.abs(out) <= 1.0))          # tanh range sanity check

    ref = _actor_reference(state, params, action_size)
    assert bool(jnp.max(jnp.abs(out - ref)) < 2e-2)    # bf16-weight tolerance

    print("KERNEL_OK")
</pallas_src>

<mosaic_0001>
module attributes {stable_mosaic.version = 11 : i64} {
  func.func @actor_kernel(%arg0: memref<8x32xbf16, #tpu.memory_space<vmem>>, %arg1: memref<288x128xbf16, #tpu.memory_space<vmem>>, %arg2: memref<8x128xf32, #tpu.memory_space<vmem>>, %arg3: memref<8x128xf32, #tpu.memory_space<vmem>>) attributes {dimension_semantics = [], scalar_prefetch = 0 : i64, scratch_operands = 0 : i64, tpu.core_type = #tpu.core_type<tc>} {
    %c0 = arith.constant 0 : index
    %c0_0 = arith.constant 0 : index
    %0 = vector.load %arg1[%c0, %c0_0] : memref<288x128xbf16, #tpu.memory_space<vmem>>, vector<32x128xbf16>
    %c32 = arith.constant 32 : index
    %c0_1 = arith.constant 0 : index
    %1 = vector.load %arg1[%c32, %c0_1] : memref<288x128xbf16, #tpu.memory_space<vmem>>, vector<128x128xbf16>
    %c160 = arith.constant 160 : index
    %c0_2 = arith.constant 0 : index
    %2 = vector.load %arg1[%c160, %c0_2] : memref<288x128xbf16, #tpu.memory_space<vmem>>, vector<128x128xbf16>
    %c0_3 = arith.constant 0 : index
    %c0_4 = arith.constant 0 : index
    %3 = vector.load %arg2[%c0_3, %c0_4] : memref<8x128xf32, #tpu.memory_space<vmem>>, vector<1x128xf32>
    %c1 = arith.constant 1 : index
    %c0_5 = arith.constant 0 : index
    %4 = vector.load %arg2[%c1, %c0_5] : memref<8x128xf32, #tpu.memory_space<vmem>>, vector<1x128xf32>
    %c2 = arith.constant 2 : index
    %c0_6 = arith.constant 0 : index
    %5 = vector.load %arg2[%c2, %c0_6] : memref<8x128xf32, #tpu.memory_space<vmem>>, vector<1x128xf32>
    %c3 = arith.constant 3 : index
    %c0_7 = arith.constant 0 : index
    %6 = vector.load %arg2[%c3, %c0_7] : memref<8x128xf32, #tpu.memory_space<vmem>>, vector<1x128xf32>
    %c4 = arith.constant 4 : index
    %c0_8 = arith.constant 0 : index
    %7 = vector.load %arg2[%c4, %c0_8] : memref<8x128xf32, #tpu.memory_space<vmem>>, vector<1x128xf32>
    %c0_9 = arith.constant 0 : index
    %c0_10 = arith.constant 0 : index
    %8 = vector.load %arg0[%c0_9, %c0_10] : memref<8x32xbf16, #tpu.memory_space<vmem>>, vector<8x32xbf16>
    %cst = arith.constant dense<0.000000e+00> : vector<8x128xf32>
    %9 = tpu.matmul %8, %0, %cst {dimension_numbers = #tpu.dot_dimension_numbers<[1], [0], [0], [1], [0, 0, 1, 1], [], []>} : vector<8x32xbf16>, vector<32x128xbf16>, vector<8x128xf32> -> vector<8x128xf32>
    %10 = vector.broadcast %3 : vector<1x128xf32> to vector<8x128xf32>
    %11 = arith.addf %9, %10 : vector<8x128xf32>
    %cst_11 = arith.constant 0.000000e+00 : f32
    %12 = vector.broadcast %cst_11 : f32 to vector<8x128xf32>
    %13 = arith.maximumf %11, %12 : vector<8x128xf32>
    %cst_12 = arith.constant dense<0.000000e+00> : vector<128xf32>
    %14 = vector.multi_reduction <add>, %13, %cst_12 [0] : vector<8x128xf32> to vector<128xf32>
    %15 = vector.shape_cast %14 : vector<128xf32> to vector<1x128xf32>
    %cst_13 = arith.constant 1.250000e-01 : f32
    %16 = vector.broadcast %cst_13 : f32 to vector<1x128xf32>
    %17 = arith.mulf %15, %16 : vector<1x128xf32>
    %18 = vector.broadcast %17 : vector<1x128xf32> to vector<8x128xf32>
    %19 = arith.subf %13, %18 : vector<8x128xf32>
    %20 = arith.mulf %19, %19 : vector<8x128xf32>
    %cst_14 = arith.constant dense<0.000000e+00> : vector<128xf32>
    %21 = vector.multi_reduction <add>, %20, %cst_14 [0] : vector<8x128xf32> to vector<128xf32>
    %22 = vector.shape_cast %21 : vector<128xf32> to vector<1x128xf32>
    %cst_15 = arith.constant 1.250000e-01 : f32
    %23 = vector.broadcast %cst_15 : f32 to vector<1x128xf32>
    %24 = arith.mulf %22, %23 : vector<1x128xf32>
    %cst_16 = arith.constant 9.99999974E-6 : f32
    %25 = vector.broadcast %cst_16 : f32 to vector<1x128xf32>
    %26 = arith.addf %24, %25 : vector<1x128xf32>
    %27 = math.rsqrt %26 : vector<1x128xf32>
    %28 = arith.mulf %27, %4 : vector<1x128xf32>
    %29 = vector.broadcast %28 : vector<1x128xf32> to vector<8x128xf32>
    %30 = arith.mulf %19, %29 : vector<8x128xf32>
    %31 = vector.broadcast %5 : vector<1x128xf32> to vector<8x128xf32>
    %32 = arith.addf %30, %31 : vector<8x128xf32>
    %33 = arith.truncf %32 : vector<8x128xf32> to vector<8x128xbf16>
    %cst_17 = arith.constant dense<0.000000e+00> : vector<8x128xf32>
    %34 = tpu.matmul %33, %1, %cst_17 {dimension_numbers = #tpu.dot_dimension_numbers<[1], [0], [0], [1], [0, 0, 1, 1], [], []>} : vector<8x128xbf16>, vector<128x128xbf16>, vector<8x128xf32> -> vector<8x128xf32>
    %35 = vector.broadcast %6 : vector<1x128xf32> to vector<8x128xf32>
    %36 = arith.addf %34, %35 : vector<8x128xf32>
    %cst_18 = arith.constant 0.000000e+00 : f32
    %37 = vector.broadcast %cst_18 : f32 to vector<8x128xf32>
    %38 = arith.maximumf %36, %37 : vector<8x128xf32>
    %39 = arith.truncf %38 : vector<8x128xf32> to vector<8x128xbf16>
    %cst_19 = arith.constant dense<0.000000e+00> : vector<8x128xf32>
    %40 = tpu.matmul %39, %2, %cst_19 {dimension_numbers = #tpu.dot_dimension_numbers<[1], [0], [0], [1], [0, 0, 1, 1], [], []>} : vector<8x128xbf16>, vector<128x128xbf16>, vector<8x128xf32> -> vector<8x128xf32>
    %41 = vector.broadcast %7 : vector<1x128xf32> to vector<8x128xf32>
    %42 = arith.addf %40, %41 : vector<8x128xf32>
    %43 = math.tanh %42 : vector<8x128xf32>
    %c0_20 = arith.constant 0 : index
    %c0_21 = arith.constant 0 : index
    %44 = vector.load %arg3[%c0_20, %c0_21] : memref<8x128xf32, #tpu.memory_space<vmem>>, vector<8x128xf32>
    tpu.vector_store %arg3[%c0_20, %c0_21], %43 {strides = array<i32>} : memref<8x128xf32, #tpu.memory_space<vmem>>, vector<8x128xf32>,
    return
  }
}

</mosaic_0001>

<bundles_post_ra>
// kernel: tpu_custom_call.1
= control target key start
LH: loop header
LB: loop body
LE: loop exit
PB: predicated region body
PF: predicated region fallthrough
CT: control target
= control target key end

     0   :  { %8 = vsyncpa [#allocation3], 0  ;;  %s703_s0 = inlined_call_operand.hbm [shape: bf16[8,32], index: 0, kind: input, shape index: {}]   ;;  %s704_s1 = inlined_call_operand.hbm [shape: bf16[288,128], index: 1, kind: input, shape index: {}]   ;;  %s705_s2 = inlined_call_operand.hbm [shape: f32[8,128], index: 2, kind: input, shape index: {}]   ;;  %s706_s3 = inlined_call_operand.hbm [shape: f32[8,128], index: 3, kind: output, shape index: {}]  }
   0x1   :  { %9 = vsyncpa [#allocation6], 0 }
   0x2   :  { %10 = vsyncpa [#allocation4], 0  ;;  %s606_s12 = smov [#allocation5]   ;;  %s512_s16 = scalar_lea.hbm %s704_s1, 2304 }
   0x3   :  { %s26_s13 = sshll.u32 %s606_s12, 4  ;;  %p513_p0 = scmp.ne.s32.totalorder %s704_s1, %s512_s16  ;;  %s27_s13 = int_to_ptr.vmem [resolvable:$true] %s26_s13 }
   0x4   :  { %p516_p1 = scmp.lt.u32.totalorder %s512_s16, %s704_s1 }
   0x6   :  { %p518_p2 = pnand %p516_p1, %p513_p0 }
   0x8   :  { %521 = shalt.err (!%p518_p2)
}
   0x9   :  { %s522_s21 = scalar_lea.vmem %s27_s13, 2304  ;;  %p527_p4 = scmp.lt.s32.totalorder %s27_s13, %s27_s13 }
   0xa   :  { %p523_p3 = scmp.ne.s32.totalorder %s27_s13, %s522_s21  ;;  %p528_p5 = scmp.lt.s32.totalorder %s522_s21, %s522_s21 }
   0xc   :  { %p529_p6 = por %p528_p5, %p527_p4 }
   0xe   :  { %p530_p7 = pnand %p529_p6, %p523_p3 }
  0x10   :  { %533 = shalt.err (!%p530_p7)
}
  0x11   :  { %s607_s22 = smov 64   ;;  %s608_s23 = smov 4  }
  0x12   :  { %32 = dma.hbm_to_vmem [thread:$0]  %s704_s1, 2304, %s27_s13, [#allocation6], %s607_s22, %s607_s22, %s608_s23  }
  0x13   :  { %s609_s26 = smov [#allocation2]   ;;  %s610_s28 = smov [#allocation7]  }
  0x14   :  { %s17_s27 = sshll.u32 %s609_s26, 4  ;;  %s39_s29 = sshll.u32 %s610_s28, 4  ;;  %s18_s27 = int_to_ptr.vmem [resolvable:$true] %s17_s27  ;;  %s40_s29 = int_to_ptr.vmem [resolvable:$true] %s39_s29 }
  0x15   :  { %s534_s5 = scalar_lea.hbm %s703_s0, 64 }
  0x16   :  { %p535_p8 = scmp.ne.s32.totalorder %s703_s0, %s534_s5  ;;  %p538_p9 = scmp.lt.u32.totalorder %s534_s5, %s703_s0 }
  0x18   :  { %p540_p10 = pnand %p538_p9, %p535_p8 }
  0x1a   :  { %543 = shalt.err (!%p540_p10)
}
  0x1b   :  { %s544_s1 = scalar_lea.vmem %s18_s27, 64  ;;  %p549_p12 = scmp.lt.s32.totalorder %s18_s27, %s18_s27 }
  0x1c   :  { %p545_p11 = scmp.ne.s32.totalorder %s18_s27, %s544_s1  ;;  %p550_p13 = scmp.lt.s32.totalorder %s544_s1, %s544_s1 }
  0x1e   :  { %p551_p0 = por %p550_p13, %p549_p12 }
  0x20   :  { %p552_p1 = pnand %p551_p0, %p545_p11 }
  0x22   :  { %555 = shalt.err (!%p552_p1)
}
  0x23   :  { %20 = dma.hbm_to_vmem [thread:$0]  %s703_s0, 64, %s18_s27, [#allocation3]  }
  0x24   :  { %s556_s14 = scalar_lea.hbm %s705_s2, 128 }
  0x25   :  { %p557_p2 = scmp.ne.s32.totalorder %s705_s2, %s556_s14  ;;  %p560_p3 = scmp.lt.u32.totalorder %s556_s14, %s705_s2 }
  0x27   :  { %p562_p4 = pnand %p560_p3, %p557_p2 }
  0x29   :  { %565 = shalt.err (!%p562_p4)
}
  0x2a   :  { %s566_s19 = scalar_lea.vmem %s40_s29, 128  ;;  %p571_p6 = scmp.lt.s32.totalorder %s40_s29, %s40_s29 }
  0x2b   :  { %p567_p5 = scmp.ne.s32.totalorder %s40_s29, %s566_s19  ;;  %p572_p7 = scmp.lt.s32.totalorder %s566_s19, %s566_s19 }
  0x2d   :  { %p573_p8 = por %p572_p7, %p571_p6 }
  0x2f   :  { %p574_p9 = pnand %p573_p8, %p567_p5 }
  0x31   :  { %577 = shalt.err (!%p574_p9)
}
  0x32   :  { %42 = dma.hbm_to_vmem [thread:$0]  %s705_s2, 128, %s40_s29, [#allocation6]  }
  0x33   :  { %600 = dma.done.wait [#allocation3], 64  }
  0x34   :  { %601 = vsyncadd [#allocation3], 4294967232 }
  0x35   :  { %602 = dma.done.wait [#allocation6], 2432  }
  0x36   :  { %603 = vsyncadd [#allocation6], 4294964864  ;;  %v611_v0 = vmov 0.0   ;;  %vm612_vm0 = vmmov 0   ;;  %v490_v1 = vld [vmem:[#allocation5] sm:$0xff]   ;;  %v491_v2 = vld [vmem:[#allocation5 + $0x8] sm:$0xff]   ;;  %v175_v42 = vlaneseq }
  0x37   :  { %434 = vmatprep.subr.bf16.mxu0 %v611_v0  ;;  %438 = vmatprep.mubr.msk.bf16.mxu0 %vm612_vm0, %v611_v0  ;;  %vm111_vm1 = vcmask 261120   ;;  %v94_v3 = vld [vmem:[#allocation2] sm:$0xf]  ;;  %v492_v4 = vld [vmem:[#allocation5 + $0x10] sm:$0xff]   ;;  %v494_v6 = vld [vmem:[#allocation5 + $0x20] sm:$0xff]   ;;  %s613_s2 = smov [#allocation8]  }
  0x38   :  { %442 = vmatprep.subr.bf16.mxu1 %v611_v0  ;;  %458 = vmatprep.mubr.msk.bf16.mxu1 %vm612_vm0, %v611_v0  ;;  %v493_v5 = vld [vmem:[#allocation5 + $0x18] sm:$0xff]   ;;  %v495_v7 = vld [vmem:[#allocation5 + $0x28] sm:$0xff]   ;;  %v496_v8 = vld [vmem:[#allocation5 + $0x30] sm:$0xff]   ;;  %v176_v43 = vshrl.u32 %v175_v42, 7  ;;  %s380_s21 = sshll.u32 %s613_s2, 4  ;;  %s381_s21 = int_to_ptr.vmem [resolvable:$true] %s380_s21 }
  0x39   :  { %435 = vmatpush3.bf16.msra.mxu0 %v490_v1  ;;  %443 = vmatpush3.bf16.msra.mxu1 %v492_v4  ;;  %v497_v9 = vld [vmem:[#allocation5 + $0x38] sm:$0xff]   ;;  %v498_v10 = vld [vmem:[#allocation5 + $0x40] sm:$0xff]   ;;  %v499_v11 = vld [vmem:[#allocation5 + $0x48] sm:$0xff]   ;;  %s578_s22 = scalar_lea.vmem %s381_s21, 128  ;;  %p583_p11 = scmp.lt.s32.totalorder %s381_s21, %s381_s21 }
  0x3a   :  { %436 = vmatprep.subr.bf16.mxu0 %v611_v0  ;;  %444 = vmatprep.subr.bf16.mxu1 %v611_v0  ;;  %v500_v12 = vld [vmem:[#allocation5 + $0x50] sm:$0xff]   ;;  %v501_v13 = vld [vmem:[#allocation5 + $0x58] sm:$0xff]   ;;  %v502_v14 = vld [vmem:[#allocation5 + $0x60] sm:$0xff]   ;;  %v177_v45 = vsub.s32 0, %v176_v43  ;;  %p579_p10 = scmp.ne.s32.totalorder %s381_s21, %s578_s22  ;;  %p584_p12 = scmp.lt.s32.totalorder %s578_s22, %s578_s22 }
  0x3b   :  { %v503_v15 = vld [vmem:[#allocation5 + $0x68] sm:$0xff]   ;;  %v504_v16 = vld [vmem:[#allocation5 + $0x70] sm:$0xff]   ;;  %v505_v17 = vld [vmem:[#allocation5 + $0x78] sm:$0xff]  }
  0x3c   :  { %v390_v18 = vld [vmem:[#allocation7] ss:$0 sm:$0xff]  ;;  %v90_v44 = vld [vmem:[#allocation7 + $0x1] sm:$0x1]  ;;  %v394_v49 = vld [vmem:[#allocation7 + $0x2] ss:$0 sm:$0xff]  ;;  %p585_p13 = por %p584_p12, %p583_p11 }
  0x3d   :  { %437 = vmatpush3.bf16.msra.mxu0 %v491_v2  ;;  %445 = vmatpush3.bf16.msra.mxu1 %v493_v5  ;;  %v506_v53 = vld [vmem:[#allocation5 + $0x80] sm:$0xff]   ;;  %v507_v54 = vld [vmem:[#allocation5 + $0x88] sm:$0xff]   ;;  %v395_v55 = vld [vmem:[#allocation7 + $0x3] ss:$0 sm:$0xff] }
  0x3e   :  { %462 = vmatprep.subr.bf16.mxu0 %v611_v0  ;;  %446 = vmatprep.subr.bf16.mxu1 %v611_v0  ;;  %v404_v63 = vld [vmem:[#allocation7 + $0x4] ss:$0 sm:$0xff]  ;;  %p586_p0 = pnand %p585_p13, %p579_p10 }
  0x40   :  { %439 = vmatmul.mubr.msk.bf16.vlgmr.msra.gmra.mrb[0].mxu0 %vm111_vm1, %v94_v3 }
  0x41   :  { %478 = vmatprep.mubr.msk.bf16.mxu0 %vm612_vm0, %v611_v0  ;;  %447 = vmatpush3.bf16.msra.mxu1 %v494_v6 }
  0x42   :  { %448 = vmatprep.subr.bf16.mxu1 %v611_v0  ;;  %463 = vmatpush3.bf16.msra.mxu0 %v500_v12 }
  0x43   :  { %464 = vmatprep.subr.bf16.mxu0 %v611_v0 }
  0x45   :  { %449 = vmatpush3.bf16.msra.mxu1 %v495_v7 }
  0x46   :  { %450 = vmatprep.subr.bf16.mxu1 %v611_v0  ;;  %465 = vmatpush3.bf16.msra.mxu0 %v501_v13 }
  0x47   :  { %466 = vmatprep.subr.bf16.mxu0 %v611_v0 }
  0x49   :  { %451 = vmatpush3.bf16.msra.mxu1 %v496_v8 }
  0x4a   :  { %452 = vmatprep.subr.bf16.mxu1 %v611_v0  ;;  %467 = vmatpush3.bf16.msra.mxu0 %v502_v14 }
  0x4b   :  { %468 = vmatprep.subr.bf16.mxu0 %v611_v0 }
  0x4d   :  { %453 = vmatpush3.bf16.msra.mxu1 %v497_v9 }
  0x4e   :  { %454 = vmatprep.subr.bf16.mxu1 %v611_v0  ;;  %469 = vmatpush3.bf16.msra.mxu0 %v503_v15 }
  0x4f   :  { %470 = vmatprep.subr.bf16.mxu0 %v611_v0 }
  0x51   :  { %455 = vmatpush3.bf16.msra.mxu1 %v498_v10 }
  0x52   :  { %456 = vmatprep.subr.bf16.mxu1 %v611_v0  ;;  %471 = vmatpush3.bf16.msra.mxu0 %v504_v16 }
  0x53   :  { %472 = vmatprep.subr.bf16.mxu0 %v611_v0 }
  0x55   :  { %457 = vmatpush3.bf16.msra.mxu1 %v499_v11 }
  0x56   :  { %473 = vmatpush3.bf16.msra.mxu0 %v505_v17 }
  0x57   :  { %474 = vmatprep.subr.bf16.mxu0 %v611_v0 }
  0x5a   :  { %475 = vmatpush3.bf16.msra.mxu0 %v506_v53 }
  0x5b   :  { %476 = vmatprep.subr.bf16.mxu0 %v611_v0 }
  0x5e   :  { %477 = vmatpush3.bf16.msra.mxu0 %v507_v54 }
 0x113   :  { %v149_v19 = vpop.f32.mrb[0].mxu0 }
 0x114   :  { %v150_v20 = vadd.f32 %v390_v18, %v149_v19  ;;  %v440_v21 = vpop.f32.mrb[1].mxu0 }
 0x115   :  { %v152_v22 = vpop.f32.mrb[2].mxu0 }
 0x116   :  { %v155_v23 = vmax.f32 %v150_v20, 0.0  ;;  %v441_v24 = vpop.f32.mrb[3].mxu0 }
 0x118   :  { %v156_v25 = vrot.slane %v155_v23, 4 }
 0x11a   :  { %v157_v26 = vadd.f32 %v156_v25, %v155_v23 }
 0x11c   :  { %v158_v27 = vrot.slane %v157_v26, 2 }
 0x11e   :  { %v159_v28 = vadd.f32 %v158_v27, %v157_v26 }
 0x120   :  { %v160_v29 = vrot.slane %v159_v28, 1 }
 0x122   :  { %v161_v30 = vadd.f32 %v160_v29, %v159_v28 }
 0x124   :  { %v162_v31 = vmul.f32 0.125, %v161_v30 }
 0x126   :  { %v163_v32 = vsub.f32 %v155_v23, %v162_v31 }
 0x128   :  { %v164_v33 = vmul.f32 %v163_v32, %v163_v32 }
 0x12a   :  { %v165_v34 = vrot.slane %v164_v33, 4 }
 0x12c   :  { %v166_v35 = vadd.f32 %v165_v34, %v164_v33 }
 0x12e   :  { %v167_v36 = vrot.slane %v166_v35, 2 }
 0x130   :  { %v168_v37 = vadd.f32 %v167_v36, %v166_v35 }
 0x132   :  { %v169_v38 = vrot.slane %v168_v37, 1 }
 0x134   :  { %v170_v39 = vadd.f32 %v169_v38, %v168_v37 }
 0x136   :  { %v171_v40 = vmul.f32 0.125, %v170_v39 }
 0x138   :  { %v172_v41 = vadd.f32 1e-05, %v171_v40 }
 0x13a   :  { %508 = vrsqrt.f32 %v172_v41 }
 0x144   :  { %v509_v46 = vpop.eup %508 }
 0x145   :  { %v174_v47 = vmul.f32 %v509_v46, %v90_v44 }
 0x147   :  { %v178_v48 = vrot.slane %v174_v47, %v177_v45 }
 0x149   :  { %v179_v50 = vmul.f32 %v178_v48, %v163_v32 }
 0x14b   :  { %v184_v51 = vadd.f32 %v394_v49, %v179_v50 }
 0x14d   :  { %v185_v52 = vpack.c.bf16 %v184_v51, %v184_v51 }
 0x14f   :  { %459 = vmatmul.mubr.bf16.vlgmr.msra.gmra.mrb[0].mxu1 %v185_v52 }
 0x222   :  { %v272_v56 = vpop.f32.mrb[0].mxu1 }
 0x223   :  { %v273_v57 = vadd.f32 %v395_v55, %v272_v56  ;;  %v460_v58 = vpop.f32.mrb[1].mxu1 }
 0x224   :  { %v275_v59 = vpop.f32.mrb[2].mxu1 }
 0x225   :  { %v278_v60 = vmax.f32 %v273_v57, 0.0  ;;  %v461_v61 = vpop.f32.mrb[3].mxu1 }
 0x227   :  { %v279_v62 = vpack.c.bf16 %v278_v60, %v278_v60 }
 0x229   :  { %479 = vmatmul.mubr.bf16.vlgmr.msra.gmra.mrb[4].mxu0 %v279_v62 }
 0x2fc   :  { %v366_v1 = vpop.f32.mrb[4].mxu0 }
 0x2fd   :  { %v367_v2 = vadd.f32 %v404_v63, %v366_v1  ;;  %v480_v3 = vpop.f32.mrb[5].mxu0 }
 0x2fe   :  { %v369_v4 = vpop.f32.mrb[6].mxu0 }
 0x2ff   :  { %510 = vtanh.f32 %v367_v2  ;;  %v481_v5 = vpop.f32.mrb[7].mxu0 }
 0x309   :  { %v511_v0 = vpop.eup %510 }
 0x30a   :  { %373 = vst [vmem:[#allocation8] sm:$0xff] %v511_v0 }
 0x30b   :  { %589 = shalt.err (!%p586_p0)
}
 0x30c   :  { %s590_s25 = scalar_lea.hbm %s706_s3, 128 }
 0x30d   :  { %p591_p1 = scmp.ne.s32.totalorder %s706_s3, %s590_s25  ;;  %p594_p2 = scmp.lt.u32.totalorder %s590_s25, %s706_s3 }
 0x30f   :  { %p596_p3 = pnand %p594_p2, %p591_p1 }
 0x311   :  { %599 = shalt.err (!%p596_p3)
}
 0x312   :  { %383 = dma.vmem_to_hbm [thread:$0]  %s381_s21, 128, %s706_s3, [#allocation4]  }
 0x313   :  { %604 = dma.done.wait [#allocation4], 128  }
 0x314   :  { %605 = vsyncadd [#allocation4], 4294967168 }
 0x315   :  { %387 = vsyncpa [#allocation3], 1 }
 0x316   :  { %388 = vsyncpa [#allocation6], 1 }
 0x317   :  { %389 = vsyncpa [#allocation4], 1 }

</bundles_post_ra>
